<compile_context>
chip_gen: v7x
topology: tpu7x:2x2x1
jax: 0.10.0
libtpu: 0.0.40
codegen_flags: <defaults>
</compile_context>

<pallas_src>
import functools
import math

import jax
import jax.numpy as jnp
from jax.experimental import pallas as pl
from jax.experimental.pallas import tpu as pltpu

# ---- model hyperparameters (small, synthetic) -------------------------------
N_NODES = 16      # number of graph nodes
N_FEAT = 8        # input feature dim
N_HID = 32        # hidden dim
N_CLASSES = 4     # output classes
N_LAYERS = 2      # number of GCNII layers
ALPHA = 0.8       # from get_alpha_beta

_LANE = 128       # TPU lane width (last-dim tile)
_SUBLANE = 8      # f32 sublane tile (second-to-last dim)


def _betas(n_layers):
    return [math.log(0.5 / (ell + 1) + 1.0) for ell in range(n_layers)]


def _round_up(x, m):
    return ((x + m - 1) // m) * m


def _pad_to(a, shape):
    pads = [(0, s - d) for d, s in zip(a.shape, shape)]
    return jnp.pad(a, pads)


# -----------------------------------------------------------------------------
# Kernel
# -----------------------------------------------------------------------------
def gcnii_kernel(x_ref, adj_ref, w_in_ref, b_in_ref, w_layers_ref,
                 w_out_ref, b_out_ref, out_ref, *, n_layers, alpha, betas):
    """Fused GCNII forward: linear_in -> [GCNIILayer + ReLU] x L -> linear_out.

    Weight refs arrive pre-transposed to (in, out) layout with lane dims padded
    to 128; layer weights are pre-scaled by beta.  Node dim is only 8-aligned.
    Biases are (1, dim) rows added via implicit sublane broadcast.
    """
    x = x_ref[...]            # (Np, Fp)   Np 8-aligned, Fp 128-aligned
    adj = adj_ref[...]        # (Np, Np)

    # linear_in: x @ W_in^T + b_in  (W already (Fp, Hp))
    h = jnp.dot(x, w_in_ref[...],
                preferred_element_type=jnp.float32) + b_in_ref[...]
    # NOTE: any zero-padded node rows of h pick up the (nonzero) bias here.
    # This is harmless only because padded rows/cols of adj are exactly zero
    # (so they never leak into real rows) and the output is sliced outside.
    x0 = h                    # x_0 = x.clone()

    for ell in range(n_layers):
        beta = betas[ell]
        # propagation on MXU
        agg = jnp.dot(adj, h, preferred_element_type=jnp.float32)      # (Np, Hp)
        support = (1.0 - alpha) * agg + alpha * x0
        # beta folded into W_l at prep time: W_l_scaled = beta * W_l
        h = (1.0 - beta) * support + jnp.dot(
            support, w_layers_ref[ell], preferred_element_type=jnp.float32)
        # ReLU
        h = jnp.maximum(h, 0.0)
        # dropout -> identity (eval mode)

    # linear_out: h @ W_out^T + b_out  (W already (Hp, Cp))
    out_ref[...] = jnp.dot(h, w_out_ref[...],
                           preferred_element_type=jnp.float32) + b_out_ref[...]


# -----------------------------------------------------------------------------
# One-time parameter preparation (call-invariant)
# -----------------------------------------------------------------------------
def prepare_params(w_in, b_in, w_layers, w_out, b_out):
    """Transpose weights to (in, out), fold beta into layer weights, and pad
    lane dims to 128.  Done once at init; removed from the per-call path."""
    n_hid, n_feat = w_in.shape
    n_classes = w_out.shape[0]
    n_layers = w_layers.shape[0]

    f_p = _round_up(n_feat, _LANE)
    h_p = _round_up(n_hid, _LANE)
    c_p = _round_up(n_classes, _LANE)

    betas = jnp.asarray(_betas(n_layers), dtype=w_layers.dtype)

    w_in_t = _pad_to(w_in.T, (f_p, h_p))                       # (Fp, Hp)
    b_in_p = _pad_to(b_in.reshape(1, -1), (1, h_p))            # (1, Hp)
    w_layers_scaled = w_layers * betas[:, None, None]          # fold beta
    w_layers_p = _pad_to(w_layers_scaled, (n_layers, h_p, h_p))
    w_out_t = _pad_to(w_out.T, (h_p, c_p))                     # (Hp, Cp)
    b_out_p = _pad_to(b_out.reshape(1, -1), (1, c_p))          # (1, Cp)

    return (w_in_t, b_in_p, w_layers_p, w_out_t, b_out_p)


# -----------------------------------------------------------------------------
# Jitted per-call path: pad x/adj -> pallas_call -> slice
# -----------------------------------------------------------------------------
@functools.partial(jax.jit, static_argnums=(7,))
def _gcnii_forward_impl(x, adj, w_in_t, b_in_p, w_layers_p, w_out_t, b_out_p,
                        n_classes):
    n, _ = x.shape
    n_layers = w_layers_p.shape[0]
    f_p = w_in_t.shape[0]
    h_p = w_in_t.shape[1]
    c_p = w_out_t.shape[1]

    # Node dim: 8-aligned sublane padding only (no 128 inflation of adj / M).
    n_p = _round_up(n, _SUBLANE)
    x_p = _pad_to(x, (n_p, f_p))          # zero-pad: exact in f32
    adj_p = _pad_to(adj, (n_p, n_p))      # padded rows/cols exactly zero

    flops = (2 * n_p * f_p * h_p
             + n_layers * (2 * n_p * n_p * h_p + 2 * n_p * h_p * h_p)
             + 2 * n_p * h_p * c_p)
    bytes_accessed = 4 * (x_p.size + adj_p.size + w_in_t.size + b_in_p.size
                          + w_layers_p.size + w_out_t.size + b_out_p.size
                          + n_p * c_p)

    kernel = functools.partial(gcnii_kernel, n_layers=n_layers, alpha=ALPHA,
                               betas=tuple(_betas(n_layers)))

    vmem = pl.BlockSpec(memory_space=pltpu.MemorySpace.VMEM)
    out_p = pl.pallas_call(
        kernel,
        out_shape=jax.ShapeDtypeStruct((n_p, c_p), jnp.float32),
        in_specs=[vmem] * 7,
        out_specs=vmem,
        cost_estimate=pl.CostEstimate(flops=flops, transcendentals=0,
                                      bytes_accessed=bytes_accessed),
    )(x_p, adj_p, w_in_t, b_in_p, w_layers_p, w_out_t, b_out_p)

    return out_p[:n, :n_classes]


def gcnii_forward(x, adj, params, n_classes):
    return _gcnii_forward_impl(x, adj, *params, n_classes)


# -----------------------------------------------------------------------------
# Plain-JAX reference mirroring the PyTorch forward
# -----------------------------------------------------------------------------
def gcnii_reference(x, adj, w_in, b_in, w_layers, w_out, b_out):
    h = x @ w_in.T + b_in
    x0 = h
    betas = _betas(w_layers.shape[0])
    for ell in range(w_layers.shape[0]):
        agg = adj @ h
        support = (1.0 - ALPHA) * agg + ALPHA * x0
        h = (1.0 - betas[ell]) * support + betas[ell] * (support @ w_layers[ell])
        h = jnp.maximum(h, 0.0)
    return h @ w_out.T + b_out


if __name__ == "__main__":
    key = jax.random.PRNGKey(0)
    k_x, k_adj, k_win, k_bin, k_wl, k_wout, k_bout = jax.random.split(key, 7)

    # inputs
    x = jax.random.normal(k_x, (N_NODES, N_FEAT), dtype=jnp.float32)
    # symmetric row-normalized-ish dense adjacency
    a = jax.random.uniform(k_adj, (N_NODES, N_NODES), dtype=jnp.float32)
    a = 0.5 * (a + a.T) + jnp.eye(N_NODES, dtype=jnp.float32)
    adj = a / jnp.sum(a, axis=1, keepdims=True)

    # deterministic parameter init (PyTorch Linear convention: (out, in))
    w_in = 0.1 * jax.random.normal(k_win, (N_HID, N_FEAT), dtype=jnp.float32)
    b_in = 0.1 * jax.random.normal(k_bin, (1, N_HID), dtype=jnp.float32)
    w_layers = 0.1 * jax.random.normal(k_wl, (N_LAYERS, N_HID, N_HID),
                                       dtype=jnp.float32)
    w_out = 0.1 * jax.random.normal(k_wout, (N_CLASSES, N_HID), dtype=jnp.float32)
    b_out = 0.1 * jax.random.normal(k_bout, (1, N_CLASSES), dtype=jnp.float32)

    # one-time param prep (pre-transpose, beta-fold, pad) — off the call path
    params = prepare_params(w_in, b_in, w_layers, w_out, b_out)
    params = jax.tree_util.tree_map(jax.block_until_ready, params)

    out = gcnii_forward(x, adj, params, N_CLASSES)
    out = jax.block_until_ready(out)

    ref = gcnii_reference(x, adj, w_in, b_in, w_layers, w_out, b_out)
    assert out.shape == (N_NODES, N_CLASSES)
    assert jnp.allclose(out, ref, rtol=1e-5, atol=1e-5), "mismatch vs reference"

    print("KERNEL_OK")
</pallas_src>

<mosaic_0001>
module attributes {stable_mosaic.version = 11 : i64} {
  func.func @gcnii_kernel(%arg0: memref<16x128xf32, #tpu.memory_space<vmem>>, %arg1: memref<16x16xf32, #tpu.memory_space<vmem>>, %arg2: memref<128x128xf32, #tpu.memory_space<vmem>>, %arg3: memref<1x128xf32, #tpu.memory_space<vmem>>, %arg4: memref<2x128x128xf32, #tpu.memory_space<vmem>>, %arg5: memref<128x128xf32, #tpu.memory_space<vmem>>, %arg6: memref<1x128xf32, #tpu.memory_space<vmem>>, %arg7: memref<16x128xf32, #tpu.memory_space<vmem>>) attributes {dimension_semantics = [], scalar_prefetch = 0 : i64, scratch_operands = 0 : i64, tpu.core_type = #tpu.core_type<tc>} {
    %c0 = arith.constant 0 : index
    %c0_0 = arith.constant 0 : index
    %0 = vector.load %arg0[%c0, %c0_0] : memref<16x128xf32, #tpu.memory_space<vmem>>, vector<16x128xf32>
    %c0_1 = arith.constant 0 : index
    %c0_2 = arith.constant 0 : index
    %1 = vector.load %arg1[%c0_1, %c0_2] : memref<16x16xf32, #tpu.memory_space<vmem>>, vector<16x16xf32>
    %c0_3 = arith.constant 0 : index
    %c0_4 = arith.constant 0 : index
    %2 = vector.load %arg2[%c0_3, %c0_4] : memref<128x128xf32, #tpu.memory_space<vmem>>, vector<128x128xf32>
    %cst = arith.constant dense<0.000000e+00> : vector<16x128xf32>
    %3 = tpu.matmul %0, %2, %cst {dimension_numbers = #tpu.dot_dimension_numbers<[1], [0], [0], [1], [0, 0, 1, 1], [], []>} : vector<16x128xf32>, vector<128x128xf32>, vector<16x128xf32> -> vector<16x128xf32>
    %c0_5 = arith.constant 0 : index
    %c0_6 = arith.constant 0 : index
    %4 = vector.load %arg3[%c0_5, %c0_6] : memref<1x128xf32, #tpu.memory_space<vmem>>, vector<1x128xf32>
    %5 = vector.broadcast %4 : vector<1x128xf32> to vector<16x128xf32>
    %6 = arith.addf %3, %5 : vector<16x128xf32>
    %cst_7 = arith.constant dense<0.000000e+00> : vector<16x128xf32>
    %7 = tpu.matmul %1, %6, %cst_7 {dimension_numbers = #tpu.dot_dimension_numbers<[1], [0], [0], [1], [0, 0, 1, 1], [], []>} : vector<16x16xf32>, vector<16x128xf32>, vector<16x128xf32> -> vector<16x128xf32>
    %cst_8 = arith.constant 2.000000e-01 : f32
    %8 = vector.broadcast %cst_8 : f32 to vector<16x128xf32>
    %9 = arith.mulf %8, %7 : vector<16x128xf32>
    %cst_9 = arith.constant 8.000000e-01 : f32
    %10 = vector.broadcast %cst_9 : f32 to vector<16x128xf32>
    %11 = arith.mulf %10, %6 : vector<16x128xf32>
    %12 = arith.addf %9, %11 : vector<16x128xf32>
    %cst_10 = arith.constant 0.594534874 : f32
    %13 = vector.broadcast %cst_10 : f32 to vector<16x128xf32>
    %14 = arith.mulf %13, %12 : vector<16x128xf32>
    %c0_11 = arith.constant 0 : index
    %c0_12 = arith.constant 0 : index
    %c0_13 = arith.constant 0 : index
    %15 = vector.load %arg4[%c0_11, %c0_12, %c0_13] : memref<2x128x128xf32, #tpu.memory_space<vmem>>, vector<1x128x128xf32>
    %16 = vector.shape_cast %15 : vector<1x128x128xf32> to vector<128x128xf32>
    %cst_14 = arith.constant dense<0.000000e+00> : vector<16x128xf32>
    %17 = tpu.matmul %12, %16, %cst_14 {dimension_numbers = #tpu.dot_dimension_numbers<[1], [0], [0], [1], [0, 0, 1, 1], [], []>} : vector<16x128xf32>, vector<128x128xf32>, vector<16x128xf32> -> vector<16x128xf32>
    %18 = arith.addf %14, %17 : vector<16x128xf32>
    %cst_15 = arith.constant 0.000000e+00 : f32
    %19 = vector.broadcast %cst_15 : f32 to vector<16x128xf32>
    %20 = arith.maximumf %18, %19 : vector<16x128xf32>
    %cst_16 = arith.constant dense<0.000000e+00> : vector<16x128xf32>
    %21 = tpu.matmul %1, %20, %cst_16 {dimension_numbers = #tpu.dot_dimension_numbers<[1], [0], [0], [1], [0, 0, 1, 1], [], []>} : vector<16x16xf32>, vector<16x128xf32>, vector<16x128xf32> -> vector<16x128xf32>
    %cst_17 = arith.constant 2.000000e-01 : f32
    %22 = vector.broadcast %cst_17 : f32 to vector<16x128xf32>
    %23 = arith.mulf %22, %21 : vector<16x128xf32>
    %cst_18 = arith.constant 8.000000e-01 : f32
    %24 = vector.broadcast %cst_18 : f32 to vector<16x128xf32>
    %25 = arith.mulf %24, %6 : vector<16x128xf32>
    %26 = arith.addf %23, %25 : vector<16x128xf32>
    %cst_19 = arith.constant 0.776856422 : f32
    %27 = vector.broadcast %cst_19 : f32 to vector<16x128xf32>
    %28 = arith.mulf %27, %26 : vector<16x128xf32>
    %c1 = arith.constant 1 : index
    %c0_20 = arith.constant 0 : index
    %c0_21 = arith.constant 0 : index
    %29 = vector.load %arg4[%c1, %c0_20, %c0_21] : memref<2x128x128xf32, #tpu.memory_space<vmem>>, vector<1x128x128xf32>
    %30 = vector.shape_cast %29 : vector<1x128x128xf32> to vector<128x128xf32>
    %cst_22 = arith.constant dense<0.000000e+00> : vector<16x128xf32>
    %31 = tpu.matmul %26, %30, %cst_22 {dimension_numbers = #tpu.dot_dimension_numbers<[1], [0], [0], [1], [0, 0, 1, 1], [], []>} : vector<16x128xf32>, vector<128x128xf32>, vector<16x128xf32> -> vector<16x128xf32>
    %32 = arith.addf %28, %31 : vector<16x128xf32>
    %cst_23 = arith.constant 0.000000e+00 : f32
    %33 = vector.broadcast %cst_23 : f32 to vector<16x128xf32>
    %34 = arith.maximumf %32, %33 : vector<16x128xf32>
    %c0_24 = arith.constant 0 : index
    %c0_25 = arith.constant 0 : index
    %35 = vector.load %arg5[%c0_24, %c0_25] : memref<128x128xf32, #tpu.memory_space<vmem>>, vector<128x128xf32>
    %cst_26 = arith.constant dense<0.000000e+00> : vector<16x128xf32>
    %36 = tpu.matmul %34, %35, %cst_26 {dimension_numbers = #tpu.dot_dimension_numbers<[1], [0], [0], [1], [0, 0, 1, 1], [], []>} : vector<16x128xf32>, vector<128x128xf32>, vector<16x128xf32> -> vector<16x128xf32>
    %c0_27 = arith.constant 0 : index
    %c0_28 = arith.constant 0 : index
    %37 = vector.load %arg6[%c0_27, %c0_28] : memref<1x128xf32, #tpu.memory_space<vmem>>, vector<1x128xf32>
    %38 = vector.broadcast %37 : vector<1x128xf32> to vector<16x128xf32>
    %39 = arith.addf %36, %38 : vector<16x128xf32>
    %c0_29 = arith.constant 0 : index
    %c0_30 = arith.constant 0 : index
    %40 = vector.load %arg7[%c0_29, %c0_30] : memref<16x128xf32, #tpu.memory_space<vmem>>, vector<16x128xf32>
    tpu.vector_store %arg7[%c0_29, %c0_30], %39 {strides = array<i32>} : memref<16x128xf32, #tpu.memory_space<vmem>>, vector<16x128xf32>,
    return
  }
}

</mosaic_0001>

<bundles_post_ra>
// kernel: _gcnii_forward_impl.1
= control target key start
LH: loop header
LB: loop body
LE: loop exit
PB: predicated region body
PF: predicated region fallthrough
CT: control target
= control target key end

     0   :  { %12 = vsyncpa [#allocation3], 0  ;;  %s1225_s0 = inlined_call_operand.vmem [shape: f32[16,128], index: 0, kind: input, shape index: {}]   ;;  %s1226_s1 = inlined_call_operand.vmem [shape: f32[16,16], index: 1, kind: input, shape index: {}]   ;;  %s1227_s2 = inlined_call_operand.hbm [shape: f32[128,128], index: 2, kind: input, shape index: {}]   ;;  %s1228_s3 = inlined_call_operand.vmem [shape: f32[1,128], index: 3, kind: input, shape index: {}]   ;;  %s1229_s4 = inlined_call_operand.hbm [shape: f32[2,128,128], index: 4, kind: input, shape index: {}]   ;;  %s1230_s5 = inlined_call_operand.hbm [shape: f32[128,128], index: 5, kind: input, shape index: {}]   ;;  %s1231_s6 = inlined_call_operand.vmem [shape: f32[1,128], index: 6, kind: input, shape index: {}]   ;;  %s1232_s7 = inlined_call_operand.vmem [shape: f32[16,128], index: 7, kind: output, shape index: {}]  }
   0x1   :  { %13 = vsyncpa [#allocation5], 0  ;;  %s1088_s24 = smov [#allocation4]   ;;  %s1089_s26 = smov [#allocation2]  }
   0x2   :  { %s37_s25 = sshll.u32 %s1088_s24, 4  ;;  %s23_s27 = sshll.u32 %s1089_s26, 4  ;;  %s38_s25 = int_to_ptr.vmem [resolvable:$true] %s37_s25  ;;  %s1133_s27 = int_to_ptr.vmem [resolvable:$true] %s23_s27 }
   0x3   :  { %s1018_s30 = scalar_lea.hbm %s1229_s4, 4096 }
   0x4   :  { %p1019_p0 = scmp.ne.s32.totalorder %s1229_s4, %s1018_s30  ;;  %p1022_p1 = scmp.lt.u32.totalorder %s1018_s30, %s1229_s4 }
   0x6   :  { %p1024_p2 = pnand %p1022_p1, %p1019_p0 }
   0x8   :  { %1027 = shalt.err (!%p1024_p2)
}
   0x9   :  { %s1028_s12 = scalar_lea.vmem %s38_s25, 4096  ;;  %p1033_p4 = scmp.lt.s32.totalorder %s38_s25, %s38_s25 }
   0xa   :  { %p1029_p3 = scmp.ne.s32.totalorder %s38_s25, %s1028_s12  ;;  %p1034_p5 = scmp.lt.s32.totalorder %s1028_s12, %s1028_s12 }
   0xc   :  { %p1035_p6 = por %p1034_p5, %p1033_p4 }
   0xe   :  { %p1036_p7 = pnand %p1035_p6, %p1029_p3 }
  0x10   :  { %1039 = shalt.err (!%p1036_p7)
}
  0x11   :  { %s1090_s13 = smov 128   ;;  %s1091_s14 = smov 8  }
  0x12   :  { %43 = dma.hbm_to_vmem [thread:$0]  %s1229_s4, 4096, %s38_s25, [#allocation5], %s1090_s13, %s1090_s13, %s1091_s14  }
  0x13   :  { %s1040_s19 = scalar_lea.hbm %s1227_s2, 2048 }
  0x14   :  { %p1041_p8 = scmp.ne.s32.totalorder %s1227_s2, %s1040_s19  ;;  %p1044_p9 = scmp.lt.u32.totalorder %s1040_s19, %s1227_s2 }
  0x16   :  { %p1046_p10 = pnand %p1044_p9, %p1041_p8 }
  0x18   :  { %1049 = shalt.err (!%p1046_p10)
}
  0x19   :  { %s1050_s24 = scalar_lea.vmem %s1133_s27, 2048  ;;  %p1055_p12 = scmp.lt.s32.totalorder %s1133_s27, %s1133_s27 }
  0x1a   :  { %p1051_p11 = scmp.ne.s32.totalorder %s1133_s27, %s1050_s24  ;;  %p1056_p13 = scmp.lt.s32.totalorder %s1050_s24, %s1050_s24 }
  0x1c   :  { %p1057_p0 = por %p1056_p13, %p1055_p12 }
  0x1e   :  { %p1058_p1 = pnand %p1057_p0, %p1051_p11 }
  0x20   :  { %1061 = shalt.err (!%p1058_p1)
}
  0x21   :  { %29 = dma.hbm_to_vmem [thread:$0]  %s1227_s2, 2048, %s1133_s27, [#allocation3], %s1090_s13, %s1090_s13, %s1091_s14  }
  0x22   :  { %s1092_s26 = smov [#allocation6]   ;;  %s1062_s8 = scalar_lea.hbm %s1230_s5, 2048 }
  0x23   :  { %s49_s28 = sshll.u32 %s1092_s26, 4  ;;  %p1063_p2 = scmp.ne.s32.totalorder %s1230_s5, %s1062_s8  ;;  %s50_s28 = int_to_ptr.vmem [resolvable:$true] %s49_s28 }
  0x24   :  { %p1066_p3 = scmp.lt.u32.totalorder %s1062_s8, %s1230_s5 }
  0x26   :  { %p1068_p4 = pnand %p1066_p3, %p1063_p2 }
  0x28   :  { %1071 = shalt.err (!%p1068_p4)
}
  0x29   :  { %s1072_s15 = scalar_lea.vmem %s50_s28, 2048  ;;  %p1077_p6 = scmp.lt.s32.totalorder %s50_s28, %s50_s28 }
  0x2a   :  { %p1073_p5 = scmp.ne.s32.totalorder %s50_s28, %s1072_s15  ;;  %p1078_p7 = scmp.lt.s32.totalorder %s1072_s15, %s1072_s15 }
  0x2c   :  { %p1079_p8 = por %p1078_p7, %p1077_p6 }
  0x2e   :  { %p1080_p9 = pnand %p1079_p8, %p1073_p5 }
  0x30   :  { %1083 = shalt.err (!%p1080_p9)
}
  0x31   :  { %55 = dma.hbm_to_vmem [thread:$0]  %s1230_s5, 2048, %s50_s28, [#allocation5], %s1090_s13, %s1090_s13, %s1091_s14  }
  0x32   :  { %1084 = dma.done.wait [#allocation3], 2048  }
  0x33   :  { %1085 = vsyncadd [#allocation3], 4294965248 }
  0x34   :  { %1086 = dma.done.wait [#allocation5], 6144  }
  0x35   :  { %1087 = vsyncadd [#allocation5], 4294961152  ;;  %v71_v0 = vld [vmem:[#allocation2] sm:$0xff]  ;;  %v72_v1 = vld [vmem:[#allocation2 + $0x8] sm:$0xff]  ;;  %vm169_vm0 = vcmask 130048  }
  0x36   :  { %v73_v2 = vld [vmem:[#allocation2 + $0x10] sm:$0xff]  ;;  %v877_v3 = vpack.c.bf16 %v72_v1, %v71_v0  ;;  %v74_v4 = vld [vmem:[#allocation2 + $0x18] sm:$0xff]  ;;  %v75_v6 = vld [vmem:[#allocation2 + $0x20] sm:$0xff] }
  0x37   :  { %v881_v5 = vpack.c.bf16 %v74_v4, %v73_v2  ;;  %v76_v7 = vld [vmem:[#allocation2 + $0x28] sm:$0xff]  ;;  %v67_v9 = vld [vmem:[%s1225_s0] sm:$0xff]  ;;  %v77_v10 = vld [vmem:[#allocation2 + $0x30] sm:$0xff] }
  0x38   :  { %878 = vmatprep.subr.bf16.mxu0 %v877_v3  ;;  %v885_v8 = vpack.c.bf16 %v76_v7, %v75_v6  ;;  %v78_v11 = vld [vmem:[#allocation2 + $0x38] sm:$0xff]  ;;  %755 = vmatprep.mubr.f32.mxu0 %v67_v9  ;;  %v79_v13 = vld [vmem:[#allocation2 + $0x40] sm:$0xff]  ;;  %v80_v14 = vld [vmem:[#allocation2 + $0x48] sm:$0xff] }
  0x39   :  { %880 = vmatpush3.bf16.msra.mxu0 %v877_v3  ;;  %v889_v12 = vpack.c.bf16 %v78_v11, %v77_v10  ;;  %v893_v15 = vpack.c.bf16 %v80_v14, %v79_v13  ;;  %v81_v16 = vld [vmem:[#allocation2 + $0x50] sm:$0xff]  ;;  %v82_v17 = vld [vmem:[#allocation2 + $0x58] sm:$0xff]  ;;  %v83_v19 = vld [vmem:[#allocation2 + $0x60] sm:$0xff] }
  0x3a   :  { %882 = vmatprep.subr.bf16.mxu0 %v881_v5  ;;  %v897_v18 = vpack.c.bf16 %v82_v17, %v81_v16  ;;  %v84_v20 = vld [vmem:[#allocation2 + $0x68] sm:$0xff]  ;;  %v85_v22 = vld [vmem:[#allocation2 + $0x70] sm:$0xff]  ;;  %v86_v23 = vld [vmem:[#allocation2 + $0x78] sm:$0xff] }
  0x3b   :  { %v901_v21 = vpack.c.bf16 %v84_v20, %v83_v19  ;;  %v905_v24 = vpack.c.bf16 %v86_v23, %v85_v22  ;;  %v68_v25 = vld [vmem:[%s1225_s0 + $0x8] sm:$0xff]  ;;  %v69_v26 = vld [vmem:[%s1226_s1] sm:$0xff]  ;;  %v261_v36 = vld [vmem:[#allocation4 + $0x10] sm:$0xff] }
  0x3c   :  { %762 = vmatprep.mubr.msk.f32.mxu1 %vm169_vm0, %v69_v26  ;;  %v637_v27 = vld [vmem:[%s1228_s3] ss:$0 sm:$0xff]  ;;  %v260_v32 = vld [vmem:[#allocation4 + $0x8] sm:$0xff]  ;;  %v262_v37 = vld [vmem:[#allocation4 + $0x18] sm:$0xff] }
  0x3d   :  { %884 = vmatpush3.bf16.msra.mxu0 %v881_v5  ;;  %v259_v31 = vld [vmem:[#allocation4] sm:$0xff]  ;;  %v1202_v38 = vld [vmem:[%s1226_s1 + $0x8] sm:$0xff]  ;;  %v917_v39 = vpack.c.bf16 %v262_v37, %v261_v36  ;;  %v265_v43 = vld [vmem:[#allocation4 + $0x30] sm:$0xff] }
  0x3e   :  { %886 = vmatprep.subr.bf16.mxu0 %v885_v8  ;;  %v913_v35 = vpack.c.bf16 %v260_v32, %v259_v31  ;;  %v263_v40 = vld [vmem:[#allocation4 + $0x20] sm:$0xff]  ;;  %v264_v41 = vld [vmem:[#allocation4 + $0x28] sm:$0xff]  ;;  %v266_v44 = vld [vmem:[#allocation4 + $0x38] sm:$0xff] }
  0x3f   :  { %v921_v42 = vpack.c.bf16 %v264_v41, %v263_v40  ;;  %v925_v45 = vpack.c.bf16 %v266_v44, %v265_v43  ;;  %v267_v46 = vld [vmem:[#allocation4 + $0x40] sm:$0xff]  ;;  %v268_v47 = vld [vmem:[#allocation4 + $0x48] sm:$0xff]  ;;  %v269_v49 = vld [vmem:[#allocation4 + $0x50] sm:$0xff] }
  0x40   :  { %v929_v48 = vpack.c.bf16 %v268_v47, %v267_v46  ;;  %v270_v50 = vld [vmem:[#allocation4 + $0x58] sm:$0xff]  ;;  %v271_v52 = vld [vmem:[#allocation4 + $0x60] sm:$0xff]  ;;  %v272_v53 = vld [vmem:[#allocation4 + $0x68] sm:$0xff] }
  0x41   :  { %888 = vmatpush3.bf16.msra.mxu0 %v885_v8  ;;  %v933_v51 = vpack.c.bf16 %v270_v50, %v269_v49  ;;  %v937_v54 = vpack.c.bf16 %v272_v53, %v271_v52  ;;  %v273_v55 = vld [vmem:[#allocation4 + $0x70] sm:$0xff]  ;;  %v274_v56 = vld [vmem:[#allocation4 + $0x78] sm:$0xff]  ;;  %v436_v9 = vld [vmem:[#allocation4 + $0x80] sm:$0xff] }
  0x42   :  { %890 = vmatprep.subr.bf16.mxu0 %v889_v12  ;;  %v941_v57 = vpack.c.bf16 %v274_v56, %v273_v55  ;;  %v437_v10 = vld [vmem:[#allocation4 + $0x88] sm:$0xff]  ;;  %v438_v14 = vld [vmem:[#allocation4 + $0x90] sm:$0xff]  ;;  %v440_v17 = vld [vmem:[#allocation4 + $0xa0] sm:$0xff] }
  0x43   :  { %v949_v13 = vpack.c.bf16 %v437_v10, %v436_v9  ;;  %v442_v20 = vld [vmem:[#allocation4 + $0xb0] sm:$0xff]  ;;  %v444_v23 = vld [vmem:[#allocation4 + $0xc0] sm:$0xff]  ;;  %v532_v36 = vld [vmem:[#allocation6 + $0x8] sm:$0xff] }
  0x44   :  { %v450_v32 = vld [vmem:[#allocation4 + $0xf0] sm:$0xff]  ;;  %v535_v41 = vld [vmem:[#allocation6 + $0x20] sm:$0xff] }
  0x45   :  { %892 = vmatpush3.bf16.msra.mxu0 %v889_v12  ;;  %v533_v37 = vld [vmem:[#allocation6 + $0x10] sm:$0xff]  ;;  %v539_v47 = vld [vmem:[#allocation6 + $0x40] sm:$0xff] }
  0x46   :  { %894 = vmatprep.subr.bf16.mxu0 %v893_v15  ;;  %v537_v44 = vld [vmem:[#allocation6 + $0x30] sm:$0xff]  ;;  %v543_v53 = vld [vmem:[#allocation6 + $0x60] sm:$0xff] }
  0x47   :  { %v541_v50 = vld [vmem:[#allocation6 + $0x50] sm:$0xff] }
  0x49   :  { %896 = vmatpush3.bf16.msra.mxu0 %v893_v15  ;;  %v439_v15 = vld [vmem:[#allocation4 + $0x98] sm:$0xff] }
  0x4a   :  { %898 = vmatprep.subr.bf16.mxu0 %v897_v18  ;;  %v953_v16 = vpack.c.bf16 %v439_v15, %v438_v14 }
  0x4d   :  { %900 = vmatpush3.bf16.msra.mxu0 %v897_v18  ;;  %v441_v18 = vld [vmem:[#allocation4 + $0xa8] sm:$0xff] }
  0x4e   :  { %902 = vmatprep.subr.bf16.mxu0 %v901_v21  ;;  %v957_v19 = vpack.c.bf16 %v441_v18, %v440_v17 }
  0x51   :  { %904 = vmatpush3.bf16.msra.mxu0 %v901_v21  ;;  %v443_v21 = vld [vmem:[#allocation4 + $0xb8] sm:$0xff] }
  0x52   :  { %906 = vmatprep.subr.bf16.mxu0 %v905_v24  ;;  %v961_v22 = vpack.c.bf16 %v443_v21, %v442_v20 }
  0x55   :  { %908 = vmatpush3.bf16.msra.mxu0 %v905_v24  ;;  %v445_v24 = vld [vmem:[#allocation4 + $0xc8] sm:$0xff] }
  0x58   :  { %756 = vmatmul.mubr.f32.vlgmr.msra.gmra.mrb[0].mxu0 %v68_v25  ;;  %v965_v25 = vpack.c.bf16 %v445_v24, %v444_v23 }
  0x59   :  { %804 = vmatprep.mubr.msk.f32.mxu0 %vm169_vm0, %v69_v26  ;;  %v446_v26 = vld [vmem:[#allocation4 + $0xd0] sm:$0xff] }
 0x12b   :  { %v757_v28 = vpop.f32.mrb[0].mxu0 }
 0x12c   :  { %v166_v29 = vadd.f32 %v757_v28, %v637_v27  ;;  %v160_v30 = vpop.f32.mrb[1].mxu0 }
 0x12d   :  { %v161_v33 = vadd.f32 %v637_v27, %v160_v30  ;;  %v447_v27 = vld [vmem:[#allocation4 + $0xd8] sm:$0xff]  ;;  %v449_v30 = vld [vmem:[#allocation4 + $0xe8] sm:$0xff] }
 0x12e   :  { %v1208_v63 = vmul.f32 0.8, %v166_v29  ;;  %v969_v28 = vpack.c.bf16 %v447_v27, %v446_v26 }
 0x12f   :  { %v909_v34 = vpack.c.bf16 %v166_v29, %v161_v33  ;;  %v1206_v61 = vmul.f32 0.8, %v161_v33  ;;  %v448_v29 = vld [vmem:[#allocation4 + $0xe0] sm:$0xff]  ;;  %v451_v33 = vld [vmem:[#allocation4 + $0xf8] sm:$0xff] }
 0x130   :  { %v973_v31 = vpack.c.bf16 %v449_v30, %v448_v29 }
 0x131   :  { %910 = vmatprep.subr.bf16.mxu1 %v909_v34 }
 0x132   :  { %912 = vmatpush3.bf16.msra.mxu1 %v909_v34  ;;  %v977_v34 = vpack.c.bf16 %v451_v33, %v450_v32 }
 0x133   :  { %914 = vmatprep.subr.bf16.mxu1 %v913_v35 }
 0x135   :  { %763 = vmatmul.mubr.msk.f32.vlgmr.msra.gmra.mrb[0].mxu1 %vm169_vm0, %v1202_v38 }
 0x136   :  { %916 = vmatpush3.bf16.msra.mxu1 %v913_v35  ;;  %v531_v35 = vld [vmem:[#allocation6] sm:$0xff] }
 0x137   :  { %918 = vmatprep.subr.bf16.mxu1 %v917_v39 }
 0x13a   :  { %920 = vmatpush3.bf16.msra.mxu1 %v917_v39  ;;  %v534_v39 = vld [vmem:[#allocation6 + $0x18] sm:$0xff] }
 0x13b   :  { %922 = vmatprep.subr.bf16.mxu1 %v921_v42  ;;  %v985_v40 = vpack.c.bf16 %v534_v39, %v533_v37 }
 0x13e   :  { %924 = vmatpush3.bf16.msra.mxu1 %v921_v42  ;;  %v536_v42 = vld [vmem:[#allocation6 + $0x28] sm:$0xff] }
 0x13f   :  { %926 = vmatprep.subr.bf16.mxu1 %v925_v45  ;;  %v989_v43 = vpack.c.bf16 %v536_v42, %v535_v41 }
 0x142   :  { %928 = vmatpush3.bf16.msra.mxu1 %v925_v45  ;;  %v538_v45 = vld [vmem:[#allocation6 + $0x38] sm:$0xff] }
 0x143   :  { %930 = vmatprep.subr.bf16.mxu1 %v929_v48  ;;  %v993_v46 = vpack.c.bf16 %v538_v45, %v537_v44 }
 0x146   :  { %932 = vmatpush3.bf16.msra.mxu1 %v929_v48  ;;  %v540_v48 = vld [vmem:[#allocation6 + $0x48] sm:$0xff] }
 0x147   :  { %934 = vmatprep.subr.bf16.mxu1 %v933_v51  ;;  %v997_v49 = vpack.c.bf16 %v540_v48, %v539_v47 }
 0x14a   :  { %936 = vmatpush3.bf16.msra.mxu1 %v933_v51  ;;  %v542_v51 = vld [vmem:[#allocation6 + $0x58] sm:$0xff] }
 0x14b   :  { %938 = vmatprep.subr.bf16.mxu1 %v937_v54  ;;  %v1001_v52 = vpack.c.bf16 %v542_v51, %v541_v50 }
 0x14e   :  { %940 = vmatpush3.bf16.msra.mxu1 %v937_v54  ;;  %v544_v54 = vld [vmem:[#allocation6 + $0x68] sm:$0xff] }
 0x14f   :  { %942 = vmatprep.subr.bf16.mxu1 %v941_v57  ;;  %v1005_v55 = vpack.c.bf16 %v544_v54, %v543_v53 }
 0x152   :  { %944 = vmatpush3.bf16.msra.mxu1 %v941_v57 }
 0x208   :  { %v764_v58 = vpop.f32.mrb[0].mxu1 }
 0x209   :  { %v252_v59 = vmul.f32 0.2, %v764_v58  ;;  %v242_v60 = vpop.f32.mrb[1].mxu1 }
 0x20a   :  { %v251_v62 = vmul.f32 0.2, %v242_v60 }
 0x20b   :  { %v256_v1 = vadd.f32 %v1208_v63, %v252_v59 }
 0x20c   :  { %v255_v0 = vadd.f32 %v1206_v61, %v251_v62 }
 0x20d   :  { %v258_v2 = vmul.f32 0.5945349, %v256_v1 }
 0x20e   :  { %797 = vmatprep.mubr.f32.mxu1 %v255_v0  ;;  %v257_v4 = vmul.f32 0.5945349, %v255_v0  ;;  %v545_v0 = vld [vmem:[#allocation6 + $0x70] sm:$0xff] }
 0x20f   :  { %798 = vmatmul.mubr.f32.vlgmr.msra.gmra.mrb[2].mxu1 %v256_v1  ;;  %v546_v1 = vld [vmem:[#allocation6 + $0x78] sm:$0xff] }
 0x2e2   :  { %v799_v3 = vpop.f32.mrb[2].mxu1 }
 0x2e3   :  { %v351_v5 = vadd.f32 %v799_v3, %v258_v2  ;;  %v341_v6 = vpop.f32.mrb[3].mxu1  ;;  %v1009_v2 = vpack.c.bf16 %v546_v1, %v545_v0 }
 0x2e4   :  { %v350_v7 = vadd.f32 %v341_v6, %v257_v4 }
 0x2e5   :  { %v353_v8 = vmax.f32 %v351_v5, 0.0 }
 0x2e6   :  { %v352_v11 = vmax.f32 %v350_v7, 0.0 }
 0x2e8   :  { %v945_v12 = vpack.c.bf16 %v353_v8, %v352_v11 }
 0x2ea   :  { %946 = vmatprep.subr.bf16.mxu0 %v945_v12 }
 0x2eb   :  { %948 = vmatpush3.bf16.msra.mxu0 %v945_v12 }
 0x2ec   :  { %950 = vmatprep.subr.bf16.mxu0 %v949_v13 }
 0x2ee   :  { %805 = vmatmul.mubr.msk.f32.vlgmr.msra.gmra.mrb[2].mxu0 %vm169_vm0, %v1202_v38  ;;  %v981_v38 = vpack.c.bf16 %v532_v36, %v531_v35 }
 0x2ef   :  { %952 = vmatpush3.bf16.msra.mxu0 %v949_v13 }
 0x2f0   :  { %954 = vmatprep.subr.bf16.mxu0 %v953_v16  ;;  %982 = vmatprep.subr.bf16.mxu1 %v981_v38 }
 0x2f1   :  { %984 = vmatpush3.bf16.msra.mxu1 %v981_v38 }
 0x2f2   :  { %986 = vmatprep.subr.bf16.mxu1 %v985_v40 }
 0x2f3   :  { %956 = vmatpush3.bf16.msra.mxu0 %v953_v16 }
 0x2f4   :  { %958 = vmatprep.subr.bf16.mxu0 %v957_v19 }
 0x2f5   :  { %988 = vmatpush3.bf16.msra.mxu1 %v985_v40 }
 0x2f6   :  { %990 = vmatprep.subr.bf16.mxu1 %v989_v43 }
 0x2f7   :  { %960 = vmatpush3.bf16.msra.mxu0 %v957_v19 }
 0x2f8   :  { %962 = vmatprep.subr.bf16.mxu0 %v961_v22 }
 0x2f9   :  { %992 = vmatpush3.bf16.msra.mxu1 %v989_v43 }
 0x2fa   :  { %994 = vmatprep.subr.bf16.mxu1 %v993_v46 }
 0x2fb   :  { %964 = vmatpush3.bf16.msra.mxu0 %v961_v22 }
 0x2fc   :  { %966 = vmatprep.subr.bf16.mxu0 %v965_v25 }
 0x2fd   :  { %996 = vmatpush3.bf16.msra.mxu1 %v993_v46 }
 0x2fe   :  { %998 = vmatprep.subr.bf16.mxu1 %v997_v49 }
 0x2ff   :  { %968 = vmatpush3.bf16.msra.mxu0 %v965_v25 }
 0x300   :  { %970 = vmatprep.subr.bf16.mxu0 %v969_v28 }
 0x301   :  { %1000 = vmatpush3.bf16.msra.mxu1 %v997_v49 }
 0x302   :  { %1002 = vmatprep.subr.bf16.mxu1 %v1001_v52 }
 0x303   :  { %972 = vmatpush3.bf16.msra.mxu0 %v969_v28 }
 0x304   :  { %974 = vmatprep.subr.bf16.mxu0 %v973_v31 }
 0x305   :  { %1004 = vmatpush3.bf16.msra.mxu1 %v1001_v52 }
 0x306   :  { %1006 = vmatprep.subr.bf16.mxu1 %v1005_v55 }
 0x307   :  { %976 = vmatpush3.bf16.msra.mxu0 %v973_v31 }
 0x308   :  { %978 = vmatprep.subr.bf16.mxu0 %v977_v34 }
 0x309   :  { %1008 = vmatpush3.bf16.msra.mxu1 %v1005_v55 }
 0x30a   :  { %1010 = vmatprep.subr.bf16.mxu1 %v1009_v2 }
 0x30b   :  { %980 = vmatpush3.bf16.msra.mxu0 %v977_v34 }
 0x30d   :  { %1012 = vmatpush3.bf16.msra.mxu1 %v1009_v2 }
 0x3c1   :  { %v806_v56 = vpop.f32.mrb[2].mxu0 }
 0x3c2   :  { %v430_v57 = vmul.f32 0.2, %v806_v56  ;;  %v420_v58 = vpop.f32.mrb[3].mxu0 }
 0x3c3   :  { %v429_v59 = vmul.f32 0.2, %v420_v58 }
 0x3c4   :  { %v432_v62 = vadd.f32 %v430_v57, %v1208_v63 }
 0x3c5   :  { %v431_v60 = vadd.f32 %v429_v59, %v1206_v61  ;;  %v642_v61 = vld [vmem:[%s1231_s6] ss:$0 sm:$0xff] }
 0x3c6   :  { %v434_v3 = vmul.f32 0.7768564, %v432_v62 }
 0x3c7   :  { %839 = vmatprep.mubr.f32.mxu0 %v431_v60  ;;  %v433_v5 = vmul.f32 0.7768564, %v431_v60 }
 0x3c8   :  { %840 = vmatmul.mubr.f32.vlgmr.msra.gmra.mrb[4].mxu0 %v432_v62 }
 0x49b   :  { %v841_v4 = vpop.f32.mrb[4].mxu0 }
 0x49c   :  { %v528_v6 = vadd.f32 %v841_v4, %v434_v3  ;;  %v518_v7 = vpop.f32.mrb[5].mxu0 }
 0x49d   :  { %v527_v8 = vadd.f32 %v518_v7, %v433_v5 }
 0x49e   :  { %v530_v10 = vmax.f32 %v528_v6, 0.0 }
 0x49f   :  { %v529_v9 = vmax.f32 %v527_v8, 0.0 }
 0x4a1   :  { %874 = vmatprep.mubr.f32.mxu1 %v529_v9 }
 0x4a2   :  { %875 = vmatmul.mubr.f32.vlgmr.msra.gmra.mrb[4].mxu1 %v530_v10 }
 0x575   :  { %v876_v63 = vpop.f32.mrb[4].mxu1 }
 0x576   :  { %v626_v11 = vadd.f32 %v876_v63, %v642_v61  ;;  %v620_v12 = vpop.f32.mrb[5].mxu1 }
 0x577   :  { %v621_v13 = vadd.f32 %v642_v61, %v620_v12 }
 0x578   :  { %630 = vst [vmem:[%s1232_s7 + $0x8] sm:$0xff] %v626_v11 }
 0x579   :  { %629 = vst [vmem:[%s1232_s7] sm:$0xff] %v621_v13 }
 0x57a   :  { %635 = vsyncpa [#allocation3], 1 }
 0x57b   :  { %636 = vsyncpa [#allocation5], 1 }

</bundles_post_ra>
